<compile_context>
chip_gen: v7x
topology: tpu7x:2x2x1
jax: 0.10.0
libtpu: 0.0.40
codegen_flags: <defaults>
</compile_context>

<pallas_src>
import functools

import jax
import jax.numpy as jnp
from jax.experimental import pallas as pl
from jax.experimental.pallas import tpu as pltpu


def _round_up(n, m):
    return ((n + m - 1) // m) * m


def _prep_gate_matrix(w):
    """(4H, X) PyTorch-layout gate matrix -> (X, 4H) right-multiply layout.

    Gate blocks reordered (i, f, g, o) -> (i, f, o, g); the i/f/o blocks are
    pre-scaled by 0.5 so sigmoid can be evaluated in-kernel as 0.5*tanh(.)+0.5
    with a single tanh dispatch over all 4H gate lanes.
    """
    i, f, g, o = jnp.split(w.astype(jnp.float32), 4, axis=0)
    return jnp.concatenate([0.5 * i, 0.5 * f, 0.5 * o, g], axis=0).T


def _prep_gate_bias(b_ih, b_hh):
    """Combined bias, reordered / scaled to match _prep_gate_matrix. (1, 4H) f32."""
    b = (b_ih + b_hh).astype(jnp.float32)
    i, f, g, o = jnp.split(b, 4, axis=0)
    return jnp.concatenate([0.5 * i, 0.5 * f, 0.5 * o, g], axis=0)[None, :]


def lstm_fc_kernel(x_ref, w_ih_ref, w_hh_ref, b_ref, w_fc_ref, b_fc_ref,
                   out_ref, *, hidden_size):
    """Full LSTM recurrence + final Linear, all operands resident in VMEM.

    x_ref:    (T, Bp, I)  bfloat16  time-major, batch padded to sublane tile
    w_ih_ref: (I, 4H)     bfloat16  gate cols (i, f, o, g); i/f/o pre-scaled 0.5
    w_hh_ref: (H, 4H)     bfloat16  same column layout / scaling
    b_ref:    (1, 4H)     float32   b_ih + b_hh, same layout / scaling
    w_fc_ref: (H, O), b_fc_ref: (1, O)   float32
    out_ref:  (Bp, O)     float32
    """
    T, Bp, I = x_ref.shape
    H = hidden_size

    w_hh = w_hh_ref[...]                          # (H, 4H) bf16, live across steps

    # ---- Hoisted input projection: one batched bf16 MXU matmul for all steps.
    x_flat = x_ref[...].reshape(T * Bp, I)        # layout-preserving merge
    xw = (jnp.dot(x_flat, w_ih_ref[...], preferred_element_type=jnp.float32)
          + b_ref[...])                           # (T*Bp, 4H) f32

    def step(xw_t, h, c):
        # Single (Bp, H) x (H, 4H) bf16 matmul on the serial critical path.
        gates = xw_t + jnp.dot(h.astype(jnp.bfloat16), w_hh,
                               preferred_element_type=jnp.float32)
        # One tanh over the full 4H gate vreg:
        #   first 3H lanes hold 0.5*z (pre-scaled) -> sigmoid = 0.5*t + 0.5,
        #   last   H lanes hold z_g                -> tanh(z_g) directly.
        t_all = jnp.tanh(gates)
        sig = 0.5 * t_all[:, :3 * H] + 0.5
        i_g = sig[:, 0 * H:1 * H]
        f_g = sig[:, 1 * H:2 * H]
        o_g = sig[:, 2 * H:3 * H]
        g_g = t_all[:, 3 * H:]
        c_new = f_g * c + i_g * g_g
        h_new = o_g * jnp.tanh(c_new)
        return h_new, c_new

    h = jnp.zeros((Bp, H), jnp.float32)
    c = jnp.zeros((Bp, H), jnp.float32)

    if T <= 16:
        # Fully unrolled (static T): sublane-aligned whole-tile slices of xw.
        for t in range(T):
            h, c = step(xw[t * Bp:(t + 1) * Bp, :], h, c)
    else:
        # Bounded unroll: keeps vreg pressure / code size in check at large T.
        def body(t, carry):
            h_i, c_i = carry
            xw_t = jax.lax.dynamic_slice_in_dim(xw, t * Bp, Bp, axis=0)
            return step(xw_t, h_i, c_i)
        h, c = jax.lax.fori_loop(0, T, body, (h, c), unroll=4)

    # ---- Final Linear on the last hidden state.
    out_ref[...] = (jnp.dot(h, w_fc_ref[...],
                            preferred_element_type=jnp.float32)
                    + b_fc_ref[...])


def lstm_model_forward(x, params, hidden_size):
    """x: (batch, seq, input) float32. Returns (batch, output) float32."""
    B, T, I = x.shape
    w_ih, w_hh, b_ih, b_hh, w_fc, b_fc = params
    H = hidden_size
    O = w_fc.shape[0]

    # Pad batch to a full f32 sublane tile so per-step ops are whole vregs.
    Bp = max(8, _round_up(B, 8))
    x_p = x.astype(jnp.float32)
    if Bp != B:
        x_p = jnp.pad(x_p, ((0, Bp - B), (0, 0), (0, 0)))
    # Time-major: every per-step gate read in the kernel becomes a whole-tile,
    # sublane-aligned slice instead of a cross-tile gather.
    x_tm = jnp.transpose(x_p, (1, 0, 2)).astype(jnp.bfloat16)        # (T, Bp, I)

    w_ih_t = _prep_gate_matrix(w_ih).astype(jnp.bfloat16)            # (I, 4H)
    w_hh_t = _prep_gate_matrix(w_hh).astype(jnp.bfloat16)            # (H, 4H)
    b = _prep_gate_bias(b_ih, b_hh)                                  # (1, 4H) f32
    w_fc_t = jnp.transpose(w_fc).astype(jnp.float32)                 # (H, O)
    b_fc_r = b_fc.reshape(1, O).astype(jnp.float32)                  # (1, O)

    flops = (2 * Bp * T * I * 4 * H        # hoisted x @ W_ih
             + 2 * Bp * T * H * 4 * H      # recurrent h @ W_hh
             + 2 * Bp * H * O)             # final fc
    transcendentals = 5 * T * Bp * H       # tanh over 4H + tanh(c) per step
    bytes_accessed = (2 * (x_tm.size + w_ih_t.size + w_hh_t.size)    # bf16
                      + 4 * (b.size + w_fc_t.size + b_fc_r.size + Bp * O))

    kernel = functools.partial(lstm_fc_kernel, hidden_size=H)
    vmem_spec = pl.BlockSpec(memory_space=pltpu.MemorySpace.VMEM)

    out = pl.pallas_call(
        kernel,
        out_shape=jax.ShapeDtypeStruct((Bp, O), jnp.float32),
        in_specs=[vmem_spec] * 6,
        out_specs=vmem_spec,
        cost_estimate=pl.CostEstimate(flops=flops,
                                      transcendentals=transcendentals,
                                      bytes_accessed=bytes_accessed),
    )(x_tm, w_ih_t, w_hh_t, b, w_fc_t, b_fc_r)

    return out[:B]


def init_params(key, input_size, hidden_size, output_size):
    """Deterministic PyTorch-like uniform(-1/sqrt(H), 1/sqrt(H)) init."""
    ks = jax.random.split(key, 6)
    bound = 1.0 / jnp.sqrt(hidden_size)
    u = lambda k, shape: jax.random.uniform(k, shape, jnp.float32, -bound, bound)
    w_ih = u(ks[0], (4 * hidden_size, input_size))
    w_hh = u(ks[1], (4 * hidden_size, hidden_size))
    b_ih = u(ks[2], (4 * hidden_size,))
    b_hh = u(ks[3], (4 * hidden_size,))
    w_fc = u(ks[4], (output_size, hidden_size))
    b_fc = u(ks[5], (output_size,))
    return (w_ih, w_hh, b_ih, b_hh, w_fc, b_fc)


def reference_forward(x, params, hidden_size):
    """Pure-JAX f32 reference mirroring PyTorch nn.LSTM + nn.Linear semantics."""
    w_ih, w_hh, b_ih, b_hh, w_fc, b_fc = params
    B, T, _ = x.shape
    H = hidden_size
    h = jnp.zeros((B, H), jnp.float32)
    c = jnp.zeros((B, H), jnp.float32)
    for t in range(T):
        gates = x[:, t, :] @ w_ih.T + b_ih + h @ w_hh.T + b_hh
        i_g = jax.nn.sigmoid(gates[:, 0:H])
        f_g = jax.nn.sigmoid(gates[:, H:2 * H])
        g_g = jnp.tanh(gates[:, 2 * H:3 * H])
        o_g = jax.nn.sigmoid(gates[:, 3 * H:4 * H])
        c = f_g * c + i_g * g_g
        h = o_g * jnp.tanh(c)
    return h @ w_fc.T + b_fc


if __name__ == "__main__":
    batch, seq, input_size, hidden_size, output_size = 2, 8, 16, 32, 8

    key = jax.random.PRNGKey(0)
    k_x, k_p = jax.random.split(key)
    x = jax.random.normal(k_x, (batch, seq, input_size), jnp.float32)
    params = init_params(k_p, input_size, hidden_size, output_size)

    out = lstm_model_forward(x, params, hidden_size)
    out = jax.block_until_ready(out)

    ref = reference_forward(x, params, hidden_size)
    assert out.shape == (batch, output_size)
    # bf16 MXU operands (f32 accumulation) vs f32 reference -> loosened tolerance.
    assert jnp.allclose(out, ref, atol=2e-2, rtol=2e-2), \
        f"mismatch: max abs err {jnp.max(jnp.abs(out - ref))}"

    print("KERNEL_OK")
</pallas_src>

<mosaic_0001>
module attributes {stable_mosaic.version = 11 : i64} {
  func.func @lstm_fc_kernel(%arg0: memref<8x8x16xbf16, #tpu.memory_space<vmem>>, %arg1: memref<16x128xbf16, #tpu.memory_space<vmem>>, %arg2: memref<32x128xbf16, #tpu.memory_space<vmem>>, %arg3: memref<1x128xf32, #tpu.memory_space<vmem>>, %arg4: memref<32x8xf32, #tpu.memory_space<vmem>>, %arg5: memref<1x8xf32, #tpu.memory_space<vmem>>, %arg6: memref<8x8xf32, #tpu.memory_space<vmem>>) attributes {dimension_semantics = [], scalar_prefetch = 0 : i64, scratch_operands = 0 : i64, tpu.core_type = #tpu.core_type<tc>} {
    %c0 = arith.constant 0 : index
    %c0_0 = arith.constant 0 : index
    %0 = vector.load %arg2[%c0, %c0_0] : memref<32x128xbf16, #tpu.memory_space<vmem>>, vector<32x128xbf16>
    %c0_1 = arith.constant 0 : index
    %c0_2 = arith.constant 0 : index
    %c0_3 = arith.constant 0 : index
    %1 = vector.load %arg0[%c0_1, %c0_2, %c0_3] : memref<8x8x16xbf16, #tpu.memory_space<vmem>>, vector<8x8x16xbf16>
    %2 = vector.shape_cast %1 : vector<8x8x16xbf16> to vector<64x16xbf16>
    %c0_4 = arith.constant 0 : index
    %c0_5 = arith.constant 0 : index
    %3 = vector.load %arg1[%c0_4, %c0_5] : memref<16x128xbf16, #tpu.memory_space<vmem>>, vector<16x128xbf16>
    %cst = arith.constant dense<0.000000e+00> : vector<64x128xf32>
    %4 = tpu.matmul %2, %3, %cst {dimension_numbers = #tpu.dot_dimension_numbers<[1], [0], [0], [1], [0, 0, 1, 1], [], []>} : vector<64x16xbf16>, vector<16x128xbf16>, vector<64x128xf32> -> vector<64x128xf32>
    %c0_6 = arith.constant 0 : index
    %c0_7 = arith.constant 0 : index
    %5 = vector.load %arg3[%c0_6, %c0_7] : memref<1x128xf32, #tpu.memory_space<vmem>>, vector<1x128xf32>
    %6 = vector.broadcast %5 : vector<1x128xf32> to vector<64x128xf32>
    %7 = arith.addf %4, %6 : vector<64x128xf32>
    %cst_8 = arith.constant 0.000000e+00 : f32
    %8 = vector.broadcast %cst_8 : f32 to vector<8x32xf32>
    %cst_9 = arith.constant 0.000000e+00 : f32
    %9 = vector.broadcast %cst_9 : f32 to vector<8x32xf32>
    %10 = vector.extract_strided_slice %7 {offsets = [0, 0], sizes = [8, 128], strides = [1, 1]} : vector<64x128xf32> to vector<8x128xf32>
    %11 = arith.truncf %8 : vector<8x32xf32> to vector<8x32xbf16>
    %cst_10 = arith.constant dense<0.000000e+00> : vector<8x128xf32>
    %12 = tpu.matmul %11, %0, %cst_10 {dimension_numbers = #tpu.dot_dimension_numbers<[1], [0], [0], [1], [0, 0, 1, 1], [], []>} : vector<8x32xbf16>, vector<32x128xbf16>, vector<8x128xf32> -> vector<8x128xf32>
    %13 = arith.addf %10, %12 : vector<8x128xf32>
    %14 = math.tanh %13 : vector<8x128xf32>
    %15 = vector.extract_strided_slice %14 {offsets = [0, 0], sizes = [8, 96], strides = [1, 1]} : vector<8x128xf32> to vector<8x96xf32>
    %cst_11 = arith.constant 5.000000e-01 : f32
    %16 = vector.broadcast %cst_11 : f32 to vector<8x96xf32>
    %17 = arith.mulf %16, %15 : vector<8x96xf32>
    %cst_12 = arith.constant 5.000000e-01 : f32
    %18 = vector.broadcast %cst_12 : f32 to vector<8x96xf32>
    %19 = arith.addf %17, %18 : vector<8x96xf32>
    %20 = vector.extract_strided_slice %19 {offsets = [0, 0], sizes = [8, 32], strides = [1, 1]} : vector<8x96xf32> to vector<8x32xf32>
    %21 = vector.extract_strided_slice %19 {offsets = [0, 32], sizes = [8, 32], strides = [1, 1]} : vector<8x96xf32> to vector<8x32xf32>
    %22 = vector.extract_strided_slice %19 {offsets = [0, 64], sizes = [8, 32], strides = [1, 1]} : vector<8x96xf32> to vector<8x32xf32>
    %23 = vector.extract_strided_slice %14 {offsets = [0, 96], sizes = [8, 32], strides = [1, 1]} : vector<8x128xf32> to vector<8x32xf32>
    %24 = arith.mulf %21, %9 : vector<8x32xf32>
    %25 = arith.mulf %20, %23 : vector<8x32xf32>
    %26 = arith.addf %24, %25 : vector<8x32xf32>
    %27 = math.tanh %26 : vector<8x32xf32>
    %28 = arith.mulf %22, %27 : vector<8x32xf32>
    %29 = vector.extract_strided_slice %7 {offsets = [8, 0], sizes = [8, 128], strides = [1, 1]} : vector<64x128xf32> to vector<8x128xf32>
    %30 = arith.truncf %28 : vector<8x32xf32> to vector<8x32xbf16>
    %cst_13 = arith.constant dense<0.000000e+00> : vector<8x128xf32>
    %31 = tpu.matmul %30, %0, %cst_13 {dimension_numbers = #tpu.dot_dimension_numbers<[1], [0], [0], [1], [0, 0, 1, 1], [], []>} : vector<8x32xbf16>, vector<32x128xbf16>, vector<8x128xf32> -> vector<8x128xf32>
    %32 = arith.addf %29, %31 : vector<8x128xf32>
    %33 = math.tanh %32 : vector<8x128xf32>
    %34 = vector.extract_strided_slice %33 {offsets = [0, 0], sizes = [8, 96], strides = [1, 1]} : vector<8x128xf32> to vector<8x96xf32>
    %cst_14 = arith.constant 5.000000e-01 : f32
    %35 = vector.broadcast %cst_14 : f32 to vector<8x96xf32>
    %36 = arith.mulf %35, %34 : vector<8x96xf32>
    %cst_15 = arith.constant 5.000000e-01 : f32
    %37 = vector.broadcast %cst_15 : f32 to vector<8x96xf32>
    %38 = arith.addf %36, %37 : vector<8x96xf32>
    %39 = vector.extract_strided_slice %38 {offsets = [0, 0], sizes = [8, 32], strides = [1, 1]} : vector<8x96xf32> to vector<8x32xf32>
    %40 = vector.extract_strided_slice %38 {offsets = [0, 32], sizes = [8, 32], strides = [1, 1]} : vector<8x96xf32> to vector<8x32xf32>
    %41 = vector.extract_strided_slice %38 {offsets = [0, 64], sizes = [8, 32], strides = [1, 1]} : vector<8x96xf32> to vector<8x32xf32>
    %42 = vector.extract_strided_slice %33 {offsets = [0, 96], sizes = [8, 32], strides = [1, 1]} : vector<8x128xf32> to vector<8x32xf32>
    %43 = arith.mulf %40, %26 : vector<8x32xf32>
    %44 = arith.mulf %39, %42 : vector<8x32xf32>
    %45 = arith.addf %43, %44 : vector<8x32xf32>
    %46 = math.tanh %45 : vector<8x32xf32>
    %47 = arith.mulf %41, %46 : vector<8x32xf32>
    %48 = vector.extract_strided_slice %7 {offsets = [16, 0], sizes = [8, 128], strides = [1, 1]} : vector<64x128xf32> to vector<8x128xf32>
    %49 = arith.truncf %47 : vector<8x32xf32> to vector<8x32xbf16>
    %cst_16 = arith.constant dense<0.000000e+00> : vector<8x128xf32>
    %50 = tpu.matmul %49, %0, %cst_16 {dimension_numbers = #tpu.dot_dimension_numbers<[1], [0], [0], [1], [0, 0, 1, 1], [], []>} : vector<8x32xbf16>, vector<32x128xbf16>, vector<8x128xf32> -> vector<8x128xf32>
    %51 = arith.addf %48, %50 : vector<8x128xf32>
    %52 = math.tanh %51 : vector<8x128xf32>
    %53 = vector.extract_strided_slice %52 {offsets = [0, 0], sizes = [8, 96], strides = [1, 1]} : vector<8x128xf32> to vector<8x96xf32>
    %cst_17 = arith.constant 5.000000e-01 : f32
    %54 = vector.broadcast %cst_17 : f32 to vector<8x96xf32>
    %55 = arith.mulf %54, %53 : vector<8x96xf32>
    %cst_18 = arith.constant 5.000000e-01 : f32
    %56 = vector.broadcast %cst_18 : f32 to vector<8x96xf32>
    %57 = arith.addf %55, %56 : vector<8x96xf32>
    %58 = vector.extract_strided_slice %57 {offsets = [0, 0], sizes = [8, 32], strides = [1, 1]} : vector<8x96xf32> to vector<8x32xf32>
    %59 = vector.extract_strided_slice %57 {offsets = [0, 32], sizes = [8, 32], strides = [1, 1]} : vector<8x96xf32> to vector<8x32xf32>
    %60 = vector.extract_strided_slice %57 {offsets = [0, 64], sizes = [8, 32], strides = [1, 1]} : vector<8x96xf32> to vector<8x32xf32>
    %61 = vector.extract_strided_slice %52 {offsets = [0, 96], sizes = [8, 32], strides = [1, 1]} : vector<8x128xf32> to vector<8x32xf32>
    %62 = arith.mulf %59, %45 : vector<8x32xf32>
    %63 = arith.mulf %58, %61 : vector<8x32xf32>
    %64 = arith.addf %62, %63 : vector<8x32xf32>
    %65 = math.tanh %64 : vector<8x32xf32>
    %66 = arith.mulf %60, %65 : vector<8x32xf32>
    %67 = vector.extract_strided_slice %7 {offsets = [24, 0], sizes = [8, 128], strides = [1, 1]} : vector<64x128xf32> to vector<8x128xf32>
    %68 = arith.truncf %66 : vector<8x32xf32> to vector<8x32xbf16>
    %cst_19 = arith.constant dense<0.000000e+00> : vector<8x128xf32>
    %69 = tpu.matmul %68, %0, %cst_19 {dimension_numbers = #tpu.dot_dimension_numbers<[1], [0], [0], [1], [0, 0, 1, 1], [], []>} : vector<8x32xbf16>, vector<32x128xbf16>, vector<8x128xf32> -> vector<8x128xf32>
    %70 = arith.addf %67, %69 : vector<8x128xf32>
    %71 = math.tanh %70 : vector<8x128xf32>
    %72 = vector.extract_strided_slice %71 {offsets = [0, 0], sizes = [8, 96], strides = [1, 1]} : vector<8x128xf32> to vector<8x96xf32>
    %cst_20 = arith.constant 5.000000e-01 : f32
    %73 = vector.broadcast %cst_20 : f32 to vector<8x96xf32>
    %74 = arith.mulf %73, %72 : vector<8x96xf32>
    %cst_21 = arith.constant 5.000000e-01 : f32
    %75 = vector.broadcast %cst_21 : f32 to vector<8x96xf32>
    %76 = arith.addf %74, %75 : vector<8x96xf32>
    %77 = vector.extract_strided_slice %76 {offsets = [0, 0], sizes = [8, 32], strides = [1, 1]} : vector<8x96xf32> to vector<8x32xf32>
    %78 = vector.extract_strided_slice %76 {offsets = [0, 32], sizes = [8, 32], strides = [1, 1]} : vector<8x96xf32> to vector<8x32xf32>
    %79 = vector.extract_strided_slice %76 {offsets = [0, 64], sizes = [8, 32], strides = [1, 1]} : vector<8x96xf32> to vector<8x32xf32>
    %80 = vector.extract_strided_slice %71 {offsets = [0, 96], sizes = [8, 32], strides = [1, 1]} : vector<8x128xf32> to vector<8x32xf32>
    %81 = arith.mulf %78, %64 : vector<8x32xf32>
    %82 = arith.mulf %77, %80 : vector<8x32xf32>
    %83 = arith.addf %81, %82 : vector<8x32xf32>
    %84 = math.tanh %83 : vector<8x32xf32>
    %85 = arith.mulf %79, %84 : vector<8x32xf32>
    %86 = vector.extract_strided_slice %7 {offsets = [32, 0], sizes = [8, 128], strides = [1, 1]} : vector<64x128xf32> to vector<8x128xf32>
    %87 = arith.truncf %85 : vector<8x32xf32> to vector<8x32xbf16>
    %cst_22 = arith.constant dense<0.000000e+00> : vector<8x128xf32>
    %88 = tpu.matmul %87, %0, %cst_22 {dimension_numbers = #tpu.dot_dimension_numbers<[1], [0], [0], [1], [0, 0, 1, 1], [], []>} : vector<8x32xbf16>, vector<32x128xbf16>, vector<8x128xf32> -> vector<8x128xf32>
    %89 = arith.addf %86, %88 : vector<8x128xf32>
    %90 = math.tanh %89 : vector<8x128xf32>
    %91 = vector.extract_strided_slice %90 {offsets = [0, 0], sizes = [8, 96], strides = [1, 1]} : vector<8x128xf32> to vector<8x96xf32>
    %cst_23 = arith.constant 5.000000e-01 : f32
    %92 = vector.broadcast %cst_23 : f32 to vector<8x96xf32>
    %93 = arith.mulf %92, %91 : vector<8x96xf32>
    %cst_24 = arith.constant 5.000000e-01 : f32
    %94 = vector.broadcast %cst_24 : f32 to vector<8x96xf32>
    %95 = arith.addf %93, %94 : vector<8x96xf32>
    %96 = vector.extract_strided_slice %95 {offsets = [0, 0], sizes = [8, 32], strides = [1, 1]} : vector<8x96xf32> to vector<8x32xf32>
    %97 = vector.extract_strided_slice %95 {offsets = [0, 32], sizes = [8, 32], strides = [1, 1]} : vector<8x96xf32> to vector<8x32xf32>
    %98 = vector.extract_strided_slice %95 {offsets = [0, 64], sizes = [8, 32], strides = [1, 1]} : vector<8x96xf32> to vector<8x32xf32>
    %99 = vector.extract_strided_slice %90 {offsets = [0, 96], sizes = [8, 32], strides = [1, 1]} : vector<8x128xf32> to vector<8x32xf32>
    %100 = arith.mulf %97, %83 : vector<8x32xf32>
    %101 = arith.mulf %96, %99 : vector<8x32xf32>
    %102 = arith.addf %100, %101 : vector<8x32xf32>
    %103 = math.tanh %102 : vector<8x32xf32>
    %104 = arith.mulf %98, %103 : vector<8x32xf32>
    %105 = vector.extract_strided_slice %7 {offsets = [40, 0], sizes = [8, 128], strides = [1, 1]} : vector<64x128xf32> to vector<8x128xf32>
    %106 = arith.truncf %104 : vector<8x32xf32> to vector<8x32xbf16>
    %cst_25 = arith.constant dense<0.000000e+00> : vector<8x128xf32>
    %107 = tpu.matmul %106, %0, %cst_25 {dimension_numbers = #tpu.dot_dimension_numbers<[1], [0], [0], [1], [0, 0, 1, 1], [], []>} : vector<8x32xbf16>, vector<32x128xbf16>, vector<8x128xf32> -> vector<8x128xf32>
    %108 = arith.addf %105, %107 : vector<8x128xf32>
    %109 = math.tanh %108 : vector<8x128xf32>
    %110 = vector.extract_strided_slice %109 {offsets = [0, 0], sizes = [8, 96], strides = [1, 1]} : vector<8x128xf32> to vector<8x96xf32>
    %cst_26 = arith.constant 5.000000e-01 : f32
    %111 = vector.broadcast %cst_26 : f32 to vector<8x96xf32>
    %112 = arith.mulf %111, %110 : vector<8x96xf32>
    %cst_27 = arith.constant 5.000000e-01 : f32
    %113 = vector.broadcast %cst_27 : f32 to vector<8x96xf32>
    %114 = arith.addf %112, %113 : vector<8x96xf32>
    %115 = vector.extract_strided_slice %114 {offsets = [0, 0], sizes = [8, 32], strides = [1, 1]} : vector<8x96xf32> to vector<8x32xf32>
    %116 = vector.extract_strided_slice %114 {offsets = [0, 32], sizes = [8, 32], strides = [1, 1]} : vector<8x96xf32> to vector<8x32xf32>
    %117 = vector.extract_strided_slice %114 {offsets = [0, 64], sizes = [8, 32], strides = [1, 1]} : vector<8x96xf32> to vector<8x32xf32>
    %118 = vector.extract_strided_slice %109 {offsets = [0, 96], sizes = [8, 32], strides = [1, 1]} : vector<8x128xf32> to vector<8x32xf32>
    %119 = arith.mulf %116, %102 : vector<8x32xf32>
    %120 = arith.mulf %115, %118 : vector<8x32xf32>
    %121 = arith.addf %119, %120 : vector<8x32xf32>
    %122 = math.tanh %121 : vector<8x32xf32>
    %123 = arith.mulf %117, %122 : vector<8x32xf32>
    %124 = vector.extract_strided_slice %7 {offsets = [48, 0], sizes = [8, 128], strides = [1, 1]} : vector<64x128xf32> to vector<8x128xf32>
    %125 = arith.truncf %123 : vector<8x32xf32> to vector<8x32xbf16>
    %cst_28 = arith.constant dense<0.000000e+00> : vector<8x128xf32>
    %126 = tpu.matmul %125, %0, %cst_28 {dimension_numbers = #tpu.dot_dimension_numbers<[1], [0], [0], [1], [0, 0, 1, 1], [], []>} : vector<8x32xbf16>, vector<32x128xbf16>, vector<8x128xf32> -> vector<8x128xf32>
    %127 = arith.addf %124, %126 : vector<8x128xf32>
    %128 = math.tanh %127 : vector<8x128xf32>
    %129 = vector.extract_strided_slice %128 {offsets = [0, 0], sizes = [8, 96], strides = [1, 1]} : vector<8x128xf32> to vector<8x96xf32>
    %cst_29 = arith.constant 5.000000e-01 : f32
    %130 = vector.broadcast %cst_29 : f32 to vector<8x96xf32>
    %131 = arith.mulf %130, %129 : vector<8x96xf32>
    %cst_30 = arith.constant 5.000000e-01 : f32
    %132 = vector.broadcast %cst_30 : f32 to vector<8x96xf32>
    %133 = arith.addf %131, %132 : vector<8x96xf32>
    %134 = vector.extract_strided_slice %133 {offsets = [0, 0], sizes = [8, 32], strides = [1, 1]} : vector<8x96xf32> to vector<8x32xf32>
    %135 = vector.extract_strided_slice %133 {offsets = [0, 32], sizes = [8, 32], strides = [1, 1]} : vector<8x96xf32> to vector<8x32xf32>
    %136 = vector.extract_strided_slice %133 {offsets = [0, 64], sizes = [8, 32], strides = [1, 1]} : vector<8x96xf32> to vector<8x32xf32>
    %137 = vector.extract_strided_slice %128 {offsets = [0, 96], sizes = [8, 32], strides = [1, 1]} : vector<8x128xf32> to vector<8x32xf32>
    %138 = arith.mulf %135, %121 : vector<8x32xf32>
    %139 = arith.mulf %134, %137 : vector<8x32xf32>
    %140 = arith.addf %138, %139 : vector<8x32xf32>
    %141 = math.tanh %140 : vector<8x32xf32>
    %142 = arith.mulf %136, %141 : vector<8x32xf32>
    %143 = vector.extract_strided_slice %7 {offsets = [56, 0], sizes = [8, 128], strides = [1, 1]} : vector<64x128xf32> to vector<8x128xf32>
    %144 = arith.truncf %142 : vector<8x32xf32> to vector<8x32xbf16>
    %cst_31 = arith.constant dense<0.000000e+00> : vector<8x128xf32>
    %145 = tpu.matmul %144, %0, %cst_31 {dimension_numbers = #tpu.dot_dimension_numbers<[1], [0], [0], [1], [0, 0, 1, 1], [], []>} : vector<8x32xbf16>, vector<32x128xbf16>, vector<8x128xf32> -> vector<8x128xf32>
    %146 = arith.addf %143, %145 : vector<8x128xf32>
    %147 = math.tanh %146 : vector<8x128xf32>
    %148 = vector.extract_strided_slice %147 {offsets = [0, 0], sizes = [8, 96], strides = [1, 1]} : vector<8x128xf32> to vector<8x96xf32>
    %cst_32 = arith.constant 5.000000e-01 : f32
    %149 = vector.broadcast %cst_32 : f32 to vector<8x96xf32>
    %150 = arith.mulf %149, %148 : vector<8x96xf32>
    %cst_33 = arith.constant 5.000000e-01 : f32
    %151 = vector.broadcast %cst_33 : f32 to vector<8x96xf32>
    %152 = arith.addf %150, %151 : vector<8x96xf32>
    %153 = vector.extract_strided_slice %152 {offsets = [0, 0], sizes = [8, 32], strides = [1, 1]} : vector<8x96xf32> to vector<8x32xf32>
    %154 = vector.extract_strided_slice %152 {offsets = [0, 32], sizes = [8, 32], strides = [1, 1]} : vector<8x96xf32> to vector<8x32xf32>
    %155 = vector.extract_strided_slice %152 {offsets = [0, 64], sizes = [8, 32], strides = [1, 1]} : vector<8x96xf32> to vector<8x32xf32>
    %156 = vector.extract_strided_slice %147 {offsets = [0, 96], sizes = [8, 32], strides = [1, 1]} : vector<8x128xf32> to vector<8x32xf32>
    %157 = arith.mulf %154, %140 : vector<8x32xf32>
    %158 = arith.mulf %153, %156 : vector<8x32xf32>
    %159 = arith.addf %157, %158 : vector<8x32xf32>
    %160 = math.tanh %159 : vector<8x32xf32>
    %161 = arith.mulf %155, %160 : vector<8x32xf32>
    %c0_34 = arith.constant 0 : index
    %c0_35 = arith.constant 0 : index
    %162 = vector.load %arg4[%c0_34, %c0_35] : memref<32x8xf32, #tpu.memory_space<vmem>>, vector<32x8xf32>
    %cst_36 = arith.constant dense<0.000000e+00> : vector<8x8xf32>
    %163 = tpu.matmul %161, %162, %cst_36 {dimension_numbers = #tpu.dot_dimension_numbers<[1], [0], [0], [1], [0, 0, 1, 1], [], []>} : vector<8x32xf32>, vector<32x8xf32>, vector<8x8xf32> -> vector<8x8xf32>
    %c0_37 = arith.constant 0 : index
    %c0_38 = arith.constant 0 : index
    %164 = vector.load %arg5[%c0_37, %c0_38] : memref<1x8xf32, #tpu.memory_space<vmem>>, vector<1x8xf32>
    %165 = vector.broadcast %164 : vector<1x8xf32> to vector<8x8xf32>
    %166 = arith.addf %163, %165 : vector<8x8xf32>
    %c0_39 = arith.constant 0 : index
    %c0_40 = arith.constant 0 : index
    %167 = vector.load %arg6[%c0_39, %c0_40] : memref<8x8xf32, #tpu.memory_space<vmem>>, vector<8x8xf32>
    tpu.vector_store %arg6[%c0_39, %c0_40], %166 {strides = array<i32>} : memref<8x8xf32, #tpu.memory_space<vmem>>, vector<8x8xf32>,
    return
  }
}

</mosaic_0001>

<bundles_post_ra>
// kernel: tpu_custom_call.1
= control target key start
LH: loop header
LB: loop body
LE: loop exit
PB: predicated region body
PF: predicated region fallthrough
CT: control target
= control target key end

     0   :  { %11 = vsyncpa [#allocation3], 0  ;;  %s1291_s0 = inlined_call_operand.vmem [shape: bf16[8,8,16], index: 0, kind: input, shape index: {}]   ;;  %s1292_s1 = inlined_call_operand.vmem [shape: bf16[16,128], index: 1, kind: input, shape index: {}]   ;;  %s1293_s2 = inlined_call_operand.hbm [shape: bf16[32,128], index: 2, kind: input, shape index: {}]   ;;  %s1294_s3 = inlined_call_operand.vmem [shape: f32[1,128], index: 3, kind: input, shape index: {}]   ;;  %s1295_s4 = inlined_call_operand.vmem [shape: f32[32,8], index: 4, kind: input, shape index: {}]   ;;  %s1296_s5 = inlined_call_operand.vmem [shape: f32[1,8], index: 5, kind: input, shape index: {}]   ;;  %s1297_s6 = inlined_call_operand.hbm [shape: f32[8,8], index: 6, kind: output, shape index: {}]  }
   0x1   :  { %12 = vsyncpa [#allocation4], 0  ;;  %s1062_s21 = smov [#allocation2]   ;;  %s1014_s25 = scalar_lea.hbm %s1293_s2, 256 }
   0x2   :  { %s22_s22 = sshll.u32 %s1062_s21, 4  ;;  %p1015_p0 = scmp.ne.s32.totalorder %s1293_s2, %s1014_s25  ;;  %s23_s22 = int_to_ptr.vmem [resolvable:$true] %s22_s22 }
   0x3   :  { %p1018_p1 = scmp.lt.u32.totalorder %s1014_s25, %s1293_s2 }
   0x5   :  { %p1020_p2 = pnand %p1018_p1, %p1015_p0 }
   0x7   :  { %1023 = shalt.err (!%p1020_p2)
}
   0x8   :  { %s1024_s30 = scalar_lea.vmem %s23_s22, 256  ;;  %p1029_p4 = scmp.lt.s32.totalorder %s23_s22, %s23_s22 }
   0x9   :  { %p1025_p3 = scmp.ne.s32.totalorder %s23_s22, %s1024_s30  ;;  %p1030_p5 = scmp.lt.s32.totalorder %s1024_s30, %s1024_s30 }
   0xb   :  { %p1031_p6 = por %p1030_p5, %p1029_p4 }
   0xd   :  { %p1032_p7 = pnand %p1031_p6, %p1025_p3 }
   0xf   :  { %1035 = shalt.err (!%p1032_p7)
}
  0x10   :  { %s1063_s7 = smov 64   ;;  %s1064_s8 = smov 4  }
  0x11   :  { %28 = dma.hbm_to_vmem [thread:$0]  %s1293_s2, 256, %s23_s22, [#allocation3], %s1063_s7, %s1063_s7, %s1064_s8  }
  0x12   :  { %1058 = dma.done.wait [#allocation3], 256  }
  0x13   :  { %1059 = vsyncadd [#allocation3], 4294967040  ;;  %v1065_v0 = vmov 0.0   ;;  %vm1066_vm0 = vmmov 0   ;;  %v975_v1 = vld [vmem:[%s1292_s1] sm:$0xff]   ;;  %vm86_vm1 = vcmask 130048  }
  0x14   :  { %885 = vmatprep.subr.bf16.mxu1 %v1065_v0  ;;  %889 = vmatprep.mubr.msk.bf16.mxu1 %vm1066_vm0, %v1065_v0  ;;  %v1126_v2 = vld [vmem:[#allocation2] sm:$0xff]   ;;  %v978_v4 = vld [vmem:[%s1291_s0 + $0x8] sm:$0xff]   ;;  %v1067_v6 = vmov 0   ;;  %s1068_s17 = smov 32   ;;  %vm176_vm2 = vcmask 261120   ;;  %v980_v45 = vld [vmem:[%s1291_s0 + $0x10] sm:$0xff]  }
  0x15   :  { %875 = vmatprep.subr.bf16.mxu0 %v975_v1  ;;  %v977_v3 = vld [vmem:[%s1291_s0] sm:$0xff]   ;;  %886 = vmatpush3.bf16.msra.mxu1 %v1126_v2  ;;  %v1137_v5 = vld [vmem:[#allocation2 + $0x8] sm:$0xff]   ;;  %v981_v46 = vld [vmem:[%s1291_s0 + $0x18] sm:$0xff]   ;;  %s1070_s30 = smov [#allocation5]   ;;  %vm803_vm3 = vcmask 64512  }
  0x16   :  { %876 = vmatpush3.bf16.msra.mxu0 %v975_v1  ;;  %877 = vmatprep.mubr.msk.bf16.mxu0 %vm86_vm1, %v977_v3  ;;  %v1156_v7 = vld [vmem:[%s1294_s3] ss:$0 sm:$0xff] }
  0x17   :  { %887 = vmatprep.subr.bf16.mxu1 %v1065_v0  ;;  %901 = vmatprep.subr.bf16.mxu0 %v1065_v0 }
  0x19   :  { %878 = vmatmul.mubr.msk.bf16.vlgmr.msra.gmra.mrb[0].mxu0 %vm86_vm1, %v978_v4  ;;  %888 = vmatpush3.bf16.msra.mxu1 %v1137_v5 }
  0x1a   :  { %902 = vmatpush3.bf16.msra.mxu0 %v1126_v2  ;;  %893 = vmatprep.subr.bf16.mxu1 %v1065_v0 }
  0x1b   :  { %903 = vmatprep.subr.bf16.mxu0 %v1065_v0  ;;  %881 = vmatprep.mubr.msk.bf16.mxu0 %vm86_vm1, %v980_v45 }
  0x1c   :  { %890 = vmatmul.mubr.bf16.vlgmr.msra.gmra.mrb[0].mxu1 %v1067_v6 }
  0x1d   :  { %894 = vmatpush3.bf16.msra.mxu1 %v1126_v2  ;;  %897 = vmatprep.mubr.msk.bf16.mxu1 %vm1066_vm0, %v1065_v0 }
  0x1e   :  { %895 = vmatprep.subr.bf16.mxu1 %v1065_v0  ;;  %904 = vmatpush3.bf16.msra.mxu0 %v1137_v5 }
  0x1f   :  { %917 = vmatprep.subr.bf16.mxu0 %v1065_v0 }
  0x21   :  { %896 = vmatpush3.bf16.msra.mxu1 %v1137_v5  ;;  %882 = vmatmul.mubr.msk.bf16.gmra.mrb[4].mxu0 %vm86_vm1, %v981_v46 }
  0x22   :  { %909 = vmatprep.subr.bf16.mxu1 %v1065_v0  ;;  %905 = vmatprep.mubr.msk.bf16.mxu0 %vm1066_vm0, %v1065_v0 }
  0xec   :  { %v1158_v8 = vpop.f32.mrb[0].mxu0 }
  0xed   :  { %v133_v9 = vpop.f32.mrb[1].mxu0  ;;  %v142_v56 = vadd.f32 %v1158_v8, %v1156_v7 }
  0xee   :  { %v134_v10 = vadd.f32 %v1156_v7, %v133_v9  ;;  %v1161_v11 = vpop.f32.mrb[2].mxu0 }
  0xef   :  { %v136_v12 = vpop.f32.mrb[3].mxu0  ;;  %v214_v13 = vpop.f32.mrb[0].mxu1 }
  0xf0   :  { %v220_v14 = vadd.f32 %v214_v13, %v134_v10  ;;  %v891_v15 = vpop.f32.mrb[1].mxu1  ;;  %v137_v31 = vadd.f32 %v1156_v7, %v136_v12 }
  0xf1   :  { %v217_v16 = vpop.f32.mrb[2].mxu1 }
  0xf2   :  { %982 = vtanh.f32 %v220_v14  ;;  %v892_v17 = vpop.f32.mrb[3].mxu1  ;;  %v145_v16 = vadd.f32 %v1161_v11, %v1156_v7 }
  0xf4   :  { %v1189_v51 = vpop.f32.mrb[4].mxu0 }
  0xf5   :  { %v1191_v52 = vpop.f32.mrb[5].mxu0 }
  0xf6   :  { %v1193_v53 = vpop.f32.mrb[6].mxu0 }
  0xf7   :  { %v1195_v54 = vpop.f32.mrb[7].mxu0 }
  0xfc   :  { %v983_v18 = vpop.eup %982 }
  0xfd   :  { %226 = vrot.lane.b32.xlu0 %v983_v18, %s1068_s17  ;;  %v222_v19 = vmul.f32 0.5, %v983_v18 }
  0xff   :  { %v223_v20 = vadd.f32 0.5, %v222_v19 }
 0x101   :  { %v224_v23 = vmul.f32 0.0, %v223_v20 }
 0x16f   :  { %v227_v21 = vpop.permute.xlu0 %226 }
 0x170   :  { %v229_v22 = vmul.f32 %v227_v21, %v223_v20 }
 0x172   :  { %231 = vrot.lane.b32.xlu0 %v229_v22, %s1068_s17 }
 0x1e4   :  { %v232_v24 = vpop.permute.xlu0 %231 }
 0x1e5   :  { %v234_v25 = vadd.f32 %v232_v24, %v224_v23 }
 0x1e7   :  { %984 = vtanh.f32 %v234_v25 }
 0x1f1   :  { %v985_v26 = vpop.eup %984 }
 0x1f2   :  { %237 = vrot.lane.b32.xlu1 %v985_v26, %s1068_s17 }
 0x264   :  { %v238_v27 = vpop.permute.xlu1 %237 }
 0x265   :  { %v240_v28 = vmul.f32 %v238_v27, %v223_v20 }
 0x267   :  { %v241_v29 = vpack.c.bf16 %v240_v28, %v240_v28 }
 0x269   :  { %243 = vrot.lane.b32.xlu1 %v241_v29, %s1063_s7 }
 0x2db   :  { %v244_v30 = vpop.permute.xlu1 %243 }
 0x2dc   :  { %898 = vmatmul.mubr.msk.bf16.vlgmr.msra.gmra.mrb[4].mxu1 %vm176_vm2, %v244_v30 }
 0x2dd   :  { %910 = vmatpush3.bf16.msra.mxu1 %v1126_v2  ;;  %913 = vmatprep.mubr.msk.bf16.mxu1 %vm1066_vm0, %v1065_v0 }
 0x2de   :  { %911 = vmatprep.subr.bf16.mxu1 %v1065_v0 }
 0x2e1   :  { %912 = vmatpush3.bf16.msra.mxu1 %v1137_v5 }
 0x2e2   :  { %925 = vmatprep.subr.bf16.mxu1 %v1065_v0 }
 0x3af   :  { %v282_v32 = vpop.f32.mrb[4].mxu1 }
 0x3b0   :  { %v288_v33 = vadd.f32 %v282_v32, %v137_v31  ;;  %v899_v34 = vpop.f32.mrb[5].mxu1 }
 0x3b1   :  { %v285_v35 = vpop.f32.mrb[6].mxu1  ;;  %v150_v34 = vadd.f32 %v1156_v7, %v1191_v52 }
 0x3b2   :  { %986 = vtanh.f32 %v288_v33  ;;  %v900_v36 = vpop.f32.mrb[7].mxu1 }
 0x3bc   :  { %v987_v37 = vpop.eup %986 }
 0x3bd   :  { %294 = vrot.lane.b32.xlu0 %v987_v37, %s1068_s17  ;;  %v290_v38 = vmul.f32 0.5, %v987_v37 }
 0x3bf   :  { %v291_v39 = vadd.f32 0.5, %v290_v38 }
 0x3c1   :  { %v292_v42 = vmul.f32 %v291_v39, %v234_v25 }
 0x42f   :  { %v295_v40 = vpop.permute.xlu0 %294 }
 0x430   :  { %v297_v41 = vmul.f32 %v295_v40, %v291_v39 }
 0x432   :  { %299 = vrot.lane.b32.xlu1 %v297_v41, %s1068_s17 }
 0x4a4   :  { %v300_v43 = vpop.permute.xlu1 %299 }
 0x4a5   :  { %v302_v44 = vadd.f32 %v300_v43, %v292_v42 }
 0x4a7   :  { %988 = vtanh.f32 %v302_v44 }
 0x4b1   :  { %v989_v47 = vpop.eup %988 }
 0x4b2   :  { %305 = vrot.lane.b32.xlu0 %v989_v47, %s1068_s17 }
 0x524   :  { %v306_v48 = vpop.permute.xlu0 %305 }
 0x525   :  { %v308_v49 = vmul.f32 %v306_v48, %v291_v39 }
 0x527   :  { %v309_v50 = vpack.c.bf16 %v308_v49, %v308_v49 }
 0x529   :  { %311 = vrot.lane.b32.xlu1 %v309_v50, %s1063_s7 }
 0x59b   :  { %v312_v55 = vpop.permute.xlu1 %311 }
 0x59c   :  { %906 = vmatmul.mubr.msk.bf16.vlgmr.msra.gmra.mrb[8].mxu0 %vm176_vm2, %v312_v55 }
 0x59d   :  { %918 = vmatpush3.bf16.msra.mxu0 %v1126_v2  ;;  %921 = vmatprep.mubr.msk.bf16.mxu0 %vm1066_vm0, %v1065_v0 }
 0x59e   :  { %919 = vmatprep.subr.bf16.mxu0 %v1065_v0 }
 0x5a1   :  { %920 = vmatpush3.bf16.msra.mxu0 %v1137_v5 }
 0x5a2   :  { %933 = vmatprep.subr.bf16.mxu0 %v1065_v0 }
 0x66f   :  { %v350_v57 = vpop.f32.mrb[8].mxu0 }
 0x670   :  { %v356_v58 = vadd.f32 %v350_v57, %v142_v56  ;;  %v907_v59 = vpop.f32.mrb[9].mxu0  ;;  %v153_v56 = vadd.f32 %v1156_v7, %v1195_v54 }
 0x671   :  { %v353_v60 = vpop.f32.mrb[10].mxu0 }
 0x672   :  { %990 = vtanh.f32 %v356_v58  ;;  %v908_v61 = vpop.f32.mrb[11].mxu0 }
 0x67c   :  { %v991_v62 = vpop.eup %990 }
 0x67d   :  { %362 = vrot.lane.b32.xlu0 %v991_v62, %s1068_s17  ;;  %v358_v63 = vmul.f32 0.5, %v991_v62 }
 0x67f   :  { %v359_v1 = vadd.f32 0.5, %v358_v63 }
 0x681   :  { %v360_v6 = vmul.f32 %v359_v1, %v302_v44 }
 0x6ef   :  { %v363_v3 = vpop.permute.xlu0 %362 }
 0x6f0   :  { %v365_v4 = vmul.f32 %v363_v3, %v359_v1 }
 0x6f2   :  { %367 = vrot.lane.b32.xlu1 %v365_v4, %s1068_s17 }
 0x764   :  { %v368_v9 = vpop.permute.xlu1 %367 }
 0x765   :  { %v370_v10 = vadd.f32 %v368_v9, %v360_v6 }
 0x767   :  { %992 = vtanh.f32 %v370_v10 }
 0x771   :  { %v993_v8 = vpop.eup %992 }
 0x772   :  { %373 = vrot.lane.b32.xlu0 %v993_v8, %s1068_s17 }
 0x7e4   :  { %v374_v12 = vpop.permute.xlu0 %373 }
 0x7e5   :  { %v376_v13 = vmul.f32 %v374_v12, %v359_v1 }
 0x7e7   :  { %v377_v14 = vpack.c.bf16 %v376_v13, %v376_v13  ;;  %v158_v13 = vadd.f32 %v1189_v51, %v1156_v7 }
 0x7e9   :  { %379 = vrot.lane.b32.xlu1 %v377_v14, %s1063_s7 }
 0x85b   :  { %v380_v15 = vpop.permute.xlu1 %379 }
 0x85c   :  { %914 = vmatmul.mubr.msk.bf16.vlgmr.msra.gmra.mrb[8].mxu1 %vm176_vm2, %v380_v15 }
 0x85d   :  { %926 = vmatpush3.bf16.msra.mxu1 %v1126_v2  ;;  %929 = vmatprep.mubr.msk.bf16.mxu1 %vm1066_vm0, %v1065_v0 }
 0x85e   :  { %927 = vmatprep.subr.bf16.mxu1 %v1065_v0 }
 0x861   :  { %928 = vmatpush3.bf16.msra.mxu1 %v1137_v5 }
 0x862   :  { %941 = vmatprep.subr.bf16.mxu1 %v1065_v0 }
 0x92f   :  { %v418_v17 = vpop.f32.mrb[8].mxu1 }
 0x930   :  { %v424_v18 = vadd.f32 %v418_v17, %v145_v16  ;;  %v915_v19 = vpop.f32.mrb[9].mxu1 }
 0x931   :  { %v421_v20 = vpop.f32.mrb[10].mxu1 }
 0x932   :  { %994 = vtanh.f32 %v424_v18  ;;  %v916_v21 = vpop.f32.mrb[11].mxu1 }
 0x93c   :  { %v995_v22 = vpop.eup %994 }
 0x93d   :  { %430 = vrot.lane.b32.xlu0 %v995_v22, %s1068_s17  ;;  %v426_v23 = vmul.f32 0.5, %v995_v22 }
 0x93f   :  { %v427_v24 = vadd.f32 0.5, %v426_v23 }
 0x941   :  { %v428_v27 = vmul.f32 %v427_v24, %v370_v10 }
 0x9af   :  { %v431_v25 = vpop.permute.xlu0 %430 }
 0x9b0   :  { %v433_v26 = vmul.f32 %v431_v25, %v427_v24 }
 0x9b2   :  { %435 = vrot.lane.b32.xlu1 %v433_v26, %s1068_s17 }
 0xa24   :  { %v436_v28 = vpop.permute.xlu1 %435 }
 0xa25   :  { %v438_v29 = vadd.f32 %v436_v28, %v428_v27 }
 0xa27   :  { %996 = vtanh.f32 %v438_v29 }
 0xa31   :  { %v997_v11 = vpop.eup %996 }
 0xa32   :  { %441 = vrot.lane.b32.xlu0 %v997_v11, %s1068_s17  ;;  %v161_v11 = vadd.f32 %v1193_v53, %v1156_v7  ;;  %v717_v7 = vld [vmem:[%s1295_s4] sm:$0xff]  ;;  %v718_v53 = vld [vmem:[%s1295_s4 + $0x8] sm:$0xff] }
 0xaa4   :  { %v442_v30 = vpop.permute.xlu0 %441 }
 0xaa5   :  { %v444_v31 = vmul.f32 %v442_v30, %v427_v24 }
 0xaa7   :  { %v445_v32 = vpack.c.bf16 %v444_v31, %v444_v31 }
 0xaa9   :  { %447 = vrot.lane.b32.xlu1 %v445_v32, %s1063_s7 }
 0xb1b   :  { %v448_v33 = vpop.permute.xlu1 %447 }
 0xb1c   :  { %922 = vmatmul.mubr.msk.bf16.vlgmr.msra.gmra.mrb[12].mxu0 %vm176_vm2, %v448_v33 }
 0xb1d   :  { %934 = vmatpush3.bf16.msra.mxu0 %v1126_v2  ;;  %937 = vmatprep.mubr.msk.bf16.mxu0 %vm1066_vm0, %v1065_v0 }
 0xb1e   :  { %935 = vmatprep.subr.bf16.mxu0 %v1065_v0 }
 0xb21   :  { %936 = vmatpush3.bf16.msra.mxu0 %v1137_v5 }
 0xbef   :  { %v486_v35 = vpop.f32.mrb[12].mxu0 }
 0xbf0   :  { %v492_v36 = vadd.f32 %v486_v35, %v150_v34  ;;  %v923_v37 = vpop.f32.mrb[13].mxu0 }
 0xbf1   :  { %v489_v38 = vpop.f32.mrb[14].mxu0 }
 0xbf2   :  { %998 = vtanh.f32 %v492_v36  ;;  %v924_v39 = vpop.f32.mrb[15].mxu0 }
 0xbfc   :  { %v999_v40 = vpop.eup %998 }
 0xbfd   :  { %498 = vrot.lane.b32.xlu0 %v999_v40, %s1068_s17  ;;  %v494_v41 = vmul.f32 0.5, %v999_v40 }
 0xbff   :  { %v495_v42 = vadd.f32 0.5, %v494_v41 }
 0xc01   :  { %v496_v45 = vmul.f32 %v495_v42, %v438_v29 }
 0xc6f   :  { %v499_v43 = vpop.permute.xlu0 %498 }
 0xc70   :  { %v501_v44 = vmul.f32 %v499_v43, %v495_v42  ;;  %v719_v43 = vld [vmem:[%s1295_s4 + $0x10] sm:$0xff] }
 0xc72   :  { %503 = vrot.lane.b32.xlu1 %v501_v44, %s1068_s17  ;;  %v1069_v44 = vmov 0.0|0.0  }
 0xc73   :  { %960 = vmatprep.subr.bf16.mxu0 %v1069_v44 }
 0xce4   :  { %v504_v46 = vpop.permute.xlu1 %503 }
 0xce5   :  { %v506_v47 = vadd.f32 %v504_v46, %v496_v45  ;;  %v961_v45 = vpack.c.bf16 %v718_v53, %v717_v7  ;;  %v720_v46 = vld [vmem:[%s1295_s4 + $0x18] sm:$0xff]  ;;  %s811_s4 = sshll.u32 %s1070_s30, 4  ;;  %s812_s4 = int_to_ptr.vmem [resolvable:$true] %s811_s4 }
 0xce6   :  { %s1036_s8 = scalar_lea.vmem %s812_s4, 128  ;;  %p1041_p9 = scmp.lt.s32.totalorder %s812_s4, %s812_s4 }
 0xce7   :  { %1000 = vtanh.f32 %v506_v47  ;;  %p1037_p8 = scmp.ne.s32.totalorder %s812_s4, %s1036_s8  ;;  %p1042_p10 = scmp.lt.s32.totalorder %s1036_s8, %s1036_s8 }
 0xce9   :  { %p1043_p11 = por %p1042_p10, %p1041_p9 }
 0xceb   :  { %p1044_p12 = pnand %p1043_p11, %p1037_p8 }
 0xcf1   :  { %v1001_v48 = vpop.eup %1000 }
 0xcf2   :  { %509 = vrot.lane.b32.xlu0 %v1001_v48, %s1068_s17 }
 0xd64   :  { %v510_v49 = vpop.permute.xlu0 %509 }
 0xd65   :  { %v512_v50 = vmul.f32 %v510_v49, %v495_v42 }
 0xd67   :  { %v513_v52 = vpack.c.bf16 %v512_v50, %v512_v50 }
 0xd69   :  { %515 = vrot.lane.b32.xlu1 %v513_v52, %s1063_s7 }
 0xddb   :  { %v516_v55 = vpop.permute.xlu1 %515 }
 0xddc   :  { %930 = vmatmul.mubr.msk.bf16.vlgmr.msra.gmra.mrb[12].mxu1 %vm176_vm2, %v516_v55  ;;  %v839_v55 = vld [vmem:[%s1296_s5] ss:$0 sm:$0xff] }
 0xddd   :  { %942 = vmatpush3.bf16.msra.mxu1 %v1126_v2  ;;  %945 = vmatprep.mubr.msk.bf16.mxu1 %vm1066_vm0, %v1065_v0 }
 0xdde   :  { %943 = vmatprep.subr.bf16.mxu1 %v1065_v0 }
 0xde1   :  { %944 = vmatpush3.bf16.msra.mxu1 %v1137_v5 }
 0xeaf   :  { %v554_v57 = vpop.f32.mrb[12].mxu1 }
 0xeb0   :  { %v560_v58 = vadd.f32 %v554_v57, %v153_v56  ;;  %v931_v59 = vpop.f32.mrb[13].mxu1 }
 0xeb1   :  { %v557_v60 = vpop.f32.mrb[14].mxu1 }
 0xeb2   :  { %1002 = vtanh.f32 %v560_v58  ;;  %v932_v61 = vpop.f32.mrb[15].mxu1 }
 0xebc   :  { %v1003_v62 = vpop.eup %1002 }
 0xebd   :  { %566 = vrot.lane.b32.xlu0 %v1003_v62, %s1068_s17  ;;  %v562_v2 = vmul.f32 0.5, %v1003_v62 }
 0xebf   :  { %v563_v63 = vadd.f32 0.5, %v562_v2 }
 0xec1   :  { %v564_v4 = vmul.f32 %v563_v63, %v506_v47  ;;  %v964_v47 = vpack.c.bf16 %v720_v46, %v719_v43 }
 0xf2f   :  { %v567_v1 = vpop.permute.xlu0 %566 }
 0xf30   :  { %v569_v3 = vmul.f32 %v567_v1, %v563_v63 }
 0xf32   :  { %571 = vrot.lane.b32.xlu1 %v569_v3, %s1068_s17 }
 0xfa4   :  { %v572_v5 = vpop.permute.xlu1 %571 }
 0xfa5   :  { %v574_v6 = vadd.f32 %v572_v5, %v564_v4 }
 0xfa7   :  { %1004 = vtanh.f32 %v574_v6 }
 0xfb1   :  { %v1005_v54 = vpop.eup %1004 }
 0xfb2   :  { %577 = vrot.lane.b32.xlu0 %v1005_v54, %s1068_s17 }
0x1024   :  { %v578_v9 = vpop.permute.xlu0 %577 }
0x1025   :  { %v580_v10 = vmul.f32 %v578_v9, %v563_v63 }
0x1027   :  { %v581_v8 = vpack.c.bf16 %v580_v10, %v580_v10 }
0x1029   :  { %583 = vrot.lane.b32.xlu1 %v581_v8, %s1063_s7 }
0x109b   :  { %v584_v12 = vpop.permute.xlu1 %583 }
0x109c   :  { %938 = vmatmul.mubr.msk.bf16.vlgmr.msra.gmra.mrb[16].mxu0 %vm176_vm2, %v584_v12 }
0x109d   :  { %957 = vmatprep.mubr.msk.f32.mxu0 %vm1066_vm0, %v1065_v0  ;;  %962 = vmatpush3.bf16.msra.mxu0 %v961_v45 }
0x109e   :  { %963 = vmatprep.subr.bf16.mxu0 %v1069_v44 }
0x10a1   :  { %965 = vmatpush3.bf16.msra.mxu0 %v964_v47 }
0x116f   :  { %v622_v14 = vpop.f32.mrb[16].mxu0 }
0x1170   :  { %v628_v15 = vadd.f32 %v622_v14, %v158_v13  ;;  %v939_v16 = vpop.f32.mrb[17].mxu0 }
0x1171   :  { %v625_v17 = vpop.f32.mrb[18].mxu0 }
0x1172   :  { %1006 = vtanh.f32 %v628_v15  ;;  %v940_v18 = vpop.f32.mrb[19].mxu0 }
0x117c   :  { %v1007_v19 = vpop.eup %1006 }
0x117d   :  { %634 = vrot.lane.b32.xlu0 %v1007_v19, %s1068_s17  ;;  %v630_v20 = vmul.f32 0.5, %v1007_v19 }
0x117f   :  { %v631_v21 = vadd.f32 0.5, %v630_v20 }
0x1181   :  { %v632_v24 = vmul.f32 %v631_v21, %v574_v6 }
0x11ef   :  { %v635_v22 = vpop.permute.xlu0 %634 }
0x11f0   :  { %v637_v23 = vmul.f32 %v635_v22, %v631_v21 }
0x11f2   :  { %639 = vrot.lane.b32.xlu1 %v637_v23, %s1068_s17 }
0x1264   :  { %v640_v0 = vpop.permute.xlu1 %639 }
0x1265   :  { %v642_v25 = vadd.f32 %v640_v0, %v632_v24 }
0x1267   :  { %1008 = vtanh.f32 %v642_v25 }
0x1271   :  { %v1009_v51 = vpop.eup %1008 }
0x1272   :  { %645 = vrot.lane.b32.xlu0 %v1009_v51, %s1068_s17 }
0x12e4   :  { %v646_v26 = vpop.permute.xlu0 %645 }
0x12e5   :  { %v648_v27 = vmul.f32 %v646_v26, %v631_v21 }
0x12e7   :  { %v649_v28 = vpack.c.bf16 %v648_v27, %v648_v27 }
0x12e9   :  { %651 = vrot.lane.b32.xlu1 %v649_v28, %s1063_s7 }
0x135b   :  { %v652_v29 = vpop.permute.xlu1 %651 }
0x135c   :  { %946 = vmatmul.mubr.msk.bf16.vlgmr.msra.gmra.mrb[16].mxu1 %vm176_vm2, %v652_v29 }
0x142f   :  { %v690_v30 = vpop.f32.mrb[16].mxu1 }
0x1430   :  { %v696_v31 = vadd.f32 %v690_v30, %v161_v11  ;;  %v947_v32 = vpop.f32.mrb[17].mxu1 }
0x1431   :  { %v693_v33 = vpop.f32.mrb[18].mxu1 }
0x1432   :  { %1010 = vtanh.f32 %v696_v31  ;;  %v948_v34 = vpop.f32.mrb[19].mxu1 }
0x143c   :  { %v1011_v35 = vpop.eup %1010 }
0x143d   :  { %702 = vrot.lane.b32.xlu0 %v1011_v35, %s1068_s17  ;;  %v698_v36 = vmul.f32 0.5, %v1011_v35 }
0x143f   :  { %v699_v37 = vadd.f32 0.5, %v698_v36 }
0x1441   :  { %v700_v40 = vmul.f32 %v699_v37, %v642_v25 }
0x14af   :  { %v703_v38 = vpop.permute.xlu0 %702 }
0x14b0   :  { %v705_v39 = vmul.f32 %v703_v38, %v699_v37 }
0x14b2   :  { %707 = vrot.lane.b32.xlu1 %v705_v39, %s1068_s17 }
0x1524   :  { %v708_v41 = vpop.permute.xlu1 %707 }
0x1525   :  { %v710_v42 = vadd.f32 %v708_v41, %v700_v40 }
0x1527   :  { %1012 = vtanh.f32 %v710_v42 }
0x1531   :  { %v1013_v48 = vpop.eup %1012 }
0x1532   :  { %713 = vrot.lane.b32.xlu0 %v1013_v48, %s1068_s17 }
0x15a4   :  { %v714_v49 = vpop.permute.xlu0 %713 }
0x15a5   :  { %v716_v50 = vmul.f32 %v714_v49, %v699_v37 }
0x15a7   :  { %729 = vrot.lane.b32.xlu1 %v716_v50, %s1063_s7 }
0x1619   :  { %v730_v52 = vpop.permute.xlu1 %729 }
0x161a   :  { %958 = vmatmul.mubr.msk.f32.vlgmr.msra.gmra.mrb[20].mxu0 %vm176_vm2, %v730_v52 }
0x16ed   :  { %v799_v56 = vpop.f32.mrb[20].mxu0 }
0x16ee   :  { %v800_v57 = vadd.f32 %v839_v55, %v799_v56  ;;  %v959_v58 = vpop.f32.mrb[21].mxu0 }
0x16f0   :  { %804 = vst.msk [vmem:[#allocation5] sm:$0xff] %vm803_vm3, %v800_v57 }
0x16f1   :  { %1047 = shalt.err (!%p1044_p12)
}
0x16f2   :  { %s1048_s10 = scalar_lea.hbm %s1297_s6, 128 }
0x16f3   :  { %p1049_p13 = scmp.ne.s32.totalorder %s1297_s6, %s1048_s10  ;;  %p1052_p0 = scmp.lt.u32.totalorder %s1048_s10, %s1297_s6 }
0x16f5   :  { %p1054_p1 = pnand %p1052_p0, %p1049_p13 }
0x16f7   :  { %1057 = shalt.err (!%p1054_p1)
}
0x16f8   :  { %814 = dma.vmem_to_hbm [thread:$0]  %s812_s4, 128, %s1297_s6, [#allocation4]  }
0x16f9   :  { %1060 = dma.done.wait [#allocation4], 128  }
0x16fa   :  { %1061 = vsyncadd [#allocation4], 4294967168 }
0x16fb   :  { %818 = vsyncpa [#allocation3], 1 }
0x16fc   :  { %819 = vsyncpa [#allocation4], 1 }

</bundles_post_ra>
